<compile_context>
chip_gen: v6e
topology: v6e:2x2x1
jax: 0.10.0
libtpu: 0.0.40
codegen_flags: <defaults>
</compile_context>

<pallas_src>
import functools

import jax
import jax.numpy as jnp
import numpy as np
from jax.experimental import pallas as pl
from jax.experimental.pallas import tpu as pltpu

# ---- model hyper-parameters (module defaults) -------------------------------
F_IN = 100            # num_features_xd
DIM = 32              # GIN hidden dim
OUT_DIM = 300         # output_dim
GIN_EPS = 0.0         # GINConv eps (train_eps=False default)
BN_EPS = 1e-5

# lane-aligned padded sizes
F_IN_P = 128
DIM_P = 128
OUT_DIM_P = 384


def _round_up(x, m):
    return ((x + m - 1) // m) * m


def _pad_to(a, shape):
    return jnp.pad(a, [(0, s - d) for d, s in zip(a.shape, shape)])


def _vmem_limit_bytes():
    cap = 64 * 1024 * 1024
    try:
        cap = int(getattr(pltpu.get_tpu_info(), "vmem_capacity_bytes", cap))
    except Exception:
        pass
    return min(96 * 1024 * 1024, int(cap * 0.8))


_VMEM_LIMIT = _vmem_limit_bytes()


# =============================== kernels =====================================
def _gin_layer_kernel(ahat_ref, x_ref, w1_ref, b1_ref, w2_ref, b2_ref,
                      scale_ref, shift_ref, o_ref):
    """One GIN layer for a row-tile of nodes.

    agg = (A + (1+eps) I)[tile] @ X                 (MXU, bf16 in / f32 acc)
    h   = ReLU(agg @ W1 + b1) @ W2 + b2             (GIN MLP)
    out = BN(ReLU(h))  with BN folded to scale/shift (inference mode)
    """
    agg = jnp.dot(ahat_ref[...], x_ref[...].astype(jnp.bfloat16),
                  preferred_element_type=jnp.float32)
    h = jnp.dot(agg.astype(jnp.bfloat16), w1_ref[...],
                preferred_element_type=jnp.float32) + b1_ref[...]
    h = jnp.maximum(h, 0.0)
    h = jnp.dot(h.astype(jnp.bfloat16), w2_ref[...],
                preferred_element_type=jnp.float32) + b2_ref[...]
    h = jnp.maximum(h, 0.0)                       # outer F.relu
    o_ref[...] = h * scale_ref[...] + shift_ref[...]   # folded BatchNorm1d


def _pool_fc_kernel(x_ref, assign_ref, wfc_ref, bfc_ref, o_ref):
    """global_add_pool (assign @ x) -> fc1_xd -> ReLU."""
    pooled = jnp.dot(assign_ref[...], x_ref[...].astype(jnp.bfloat16),
                     preferred_element_type=jnp.float32)          # [B, DIM_P]
    out = jnp.dot(pooled.astype(jnp.bfloat16), wfc_ref[...],
                  preferred_element_type=jnp.float32) + bfc_ref[...]
    o_ref[...] = jnp.maximum(out, 0.0)


# ============================ pallas_call glue ================================
def _gin_layer_call(x, ahat, w1, b1, w2, b2, scale, shift, *, tile_n):
    n_pad, d_in = x.shape
    grid = (n_pad // tile_n,)
    return pl.pallas_call(
        _gin_layer_kernel,
        grid=grid,
        in_specs=[
            pl.BlockSpec((tile_n, n_pad), lambda i: (i, 0)),   # Ahat row tile
            pl.BlockSpec((n_pad, d_in), lambda i: (0, 0)),     # full X, resident
            pl.BlockSpec((d_in, DIM_P), lambda i: (0, 0)),     # W1 (bf16)
            pl.BlockSpec((1, DIM_P), lambda i: (0, 0)),        # b1
            pl.BlockSpec((DIM_P, DIM_P), lambda i: (0, 0)),    # W2 (bf16)
            pl.BlockSpec((1, DIM_P), lambda i: (0, 0)),        # b2
            pl.BlockSpec((1, DIM_P), lambda i: (0, 0)),        # BN scale
            pl.BlockSpec((1, DIM_P), lambda i: (0, 0)),        # BN shift
        ],
        out_specs=pl.BlockSpec((tile_n, DIM_P), lambda i: (i, 0)),
        out_shape=jax.ShapeDtypeStruct((n_pad, DIM_P), jnp.float32),
        compiler_params=pltpu.CompilerParams(
            dimension_semantics=("parallel",),
            vmem_limit_bytes=_VMEM_LIMIT),
    )(ahat, x, w1, b1, w2, b2, scale, shift)


def _pool_fc_call(x, assign, wfc, bfc):
    n_pad = x.shape[0]
    b_pad = assign.shape[0]
    return pl.pallas_call(
        _pool_fc_kernel,
        grid=(1,),
        in_specs=[
            pl.BlockSpec((n_pad, DIM_P), lambda i: (0, 0)),
            pl.BlockSpec((b_pad, n_pad), lambda i: (0, 0)),
            pl.BlockSpec((DIM_P, OUT_DIM_P), lambda i: (0, 0)),
            pl.BlockSpec((1, OUT_DIM_P), lambda i: (0, 0)),
        ],
        out_specs=pl.BlockSpec((b_pad, OUT_DIM_P), lambda i: (0, 0)),
        out_shape=jax.ShapeDtypeStruct((b_pad, OUT_DIM_P), jnp.float32),
        compiler_params=pltpu.CompilerParams(
            dimension_semantics=("arbitrary",),
            vmem_limit_bytes=_VMEM_LIMIT),
    )(x, assign, wfc, bfc)


@functools.partial(jax.jit, static_argnames=("tile_n",))
def ginconvnet_forward(x_p, ahat_p, assign_p, params, tile_n):
    h = x_p
    for lyr in params["layers"]:
        h = _gin_layer_call(h, ahat_p, lyr["w1"], lyr["b1"], lyr["w2"],
                            lyr["b2"], lyr["scale"], lyr["shift"], tile_n=tile_n)
    return _pool_fc_call(h, assign_p, params["wfc"], params["bfc"])


# ========================== wrapper-side precompute ===========================
def _choose_tile_n(n):
    return 128 if n >= 128 else 8


def prepare_params(raw):
    """Pad to lane-aligned shapes, cast weights to bf16, fold BatchNorm."""
    # TODO(synk): BatchNorm1d training-mode batch statistics are not implemented;
    #             inference-mode running stats are folded into scale/shift.
    layers = []
    for lyr in raw["layers"]:
        d_in_p = _round_up(lyr["w1"].shape[0], 128)
        scale = lyr["gamma"] / jnp.sqrt(lyr["var"] + BN_EPS)
        shift = lyr["beta"] - lyr["mean"] * scale
        layers.append(dict(
            w1=_pad_to(lyr["w1"], (d_in_p, DIM_P)).astype(jnp.bfloat16),
            b1=_pad_to(lyr["b1"][None, :], (1, DIM_P)),
            w2=_pad_to(lyr["w2"], (DIM_P, DIM_P)).astype(jnp.bfloat16),
            b2=_pad_to(lyr["b2"][None, :], (1, DIM_P)),
            scale=_pad_to(scale[None, :], (1, DIM_P)),
            shift=_pad_to(shift[None, :], (1, DIM_P)),
        ))
    return dict(
        layers=layers,
        wfc=_pad_to(raw["wfc"], (DIM_P, OUT_DIM_P)).astype(jnp.bfloat16),
        bfc=_pad_to(raw["bfc"][None, :], (1, OUT_DIM_P)),
    )


def prepare_graph(x, adj, assign, tile_n):
    """Pad nodes/features, fold GIN self-term into the adjacency."""
    n = x.shape[0]
    n_pad = _round_up(n, tile_n)
    b_pad = _round_up(assign.shape[0], 8)
    ahat = adj + (1.0 + GIN_EPS) * jnp.eye(n, dtype=jnp.float32)
    ahat_p = _pad_to(ahat, (n_pad, n_pad)).astype(jnp.bfloat16)
    x_p = _pad_to(x, (n_pad, _round_up(x.shape[1], 128)))
    assign_p = _pad_to(assign, (b_pad, n_pad)).astype(jnp.bfloat16)
    return x_p, ahat_p, assign_p


# ============================ pure-JAX reference ==============================
def reference_forward(x, adj, assign, raw):
    """Unpadded GINConvNet forward (same bf16-matmul / f32-accumulate numerics)."""
    ahat = adj + (1.0 + GIN_EPS) * jnp.eye(adj.shape[0], dtype=jnp.float32)
    h = x
    for lyr in raw["layers"]:
        agg = jnp.dot(ahat.astype(jnp.bfloat16), h.astype(jnp.bfloat16),
                      preferred_element_type=jnp.float32)
        z = jnp.dot(agg.astype(jnp.bfloat16), lyr["w1"].astype(jnp.bfloat16),
                    preferred_element_type=jnp.float32) + lyr["b1"]
        z = jnp.maximum(z, 0.0)
        z = jnp.dot(z.astype(jnp.bfloat16), lyr["w2"].astype(jnp.bfloat16),
                    preferred_element_type=jnp.float32) + lyr["b2"]
        z = jnp.maximum(z, 0.0)
        scale = lyr["gamma"] / jnp.sqrt(lyr["var"] + BN_EPS)
        shift = lyr["beta"] - lyr["mean"] * scale
        h = z * scale + shift
    pooled = jnp.dot(assign.astype(jnp.bfloat16), h.astype(jnp.bfloat16),
                     preferred_element_type=jnp.float32)
    out = jnp.dot(pooled.astype(jnp.bfloat16), raw["wfc"].astype(jnp.bfloat16),
                  preferred_element_type=jnp.float32) + raw["bfc"]
    return jnp.maximum(out, 0.0)


# =================================== main =====================================
if __name__ == "__main__":
    keys = iter(jax.random.split(jax.random.PRNGKey(0), 64))
    nk = lambda: next(keys)

    # small synthetic graph batch: 16 nodes, 2 graphs (8 nodes each)
    N, B = 16, 2
    batch = jnp.array([0] * 8 + [1] * 8, dtype=jnp.int32)
    x = jax.random.normal(nk(), (N, F_IN), jnp.float32)

    same_graph = batch[:, None] == batch[None, :]
    rand = jax.random.uniform(nk(), (N, N))
    rand = 0.5 * (rand + rand.T)                    # undirected edges
    adj = ((rand < 0.35) & same_graph & (~jnp.eye(N, dtype=bool))).astype(jnp.float32)
    assign = (batch[None, :] == jnp.arange(B)[:, None]).astype(jnp.float32)   # [B, N]

    def glorot(k, shape):
        return jax.random.normal(k, shape, jnp.float32) / jnp.sqrt(float(shape[0]))

    layers_raw = []
    d_in = F_IN
    for _ in range(5):
        layers_raw.append(dict(
            w1=glorot(nk(), (d_in, DIM)),
            b1=0.05 * jax.random.normal(nk(), (DIM,), jnp.float32),
            w2=glorot(nk(), (DIM, DIM)),
            b2=0.05 * jax.random.normal(nk(), (DIM,), jnp.float32),
            gamma=jax.random.uniform(nk(), (DIM,), jnp.float32, 0.5, 1.5),
            beta=0.1 * jax.random.normal(nk(), (DIM,), jnp.float32),
            mean=0.1 * jax.random.normal(nk(), (DIM,), jnp.float32),
            var=jax.random.uniform(nk(), (DIM,), jnp.float32, 0.5, 1.5),
        ))
        d_in = DIM
    raw_params = dict(
        layers=layers_raw,
        wfc=glorot(nk(), (DIM, OUT_DIM)),
        bfc=0.05 * jax.random.normal(nk(), (OUT_DIM,), jnp.float32),
    )
    # NOTE: nn.Dropout(0.2) is defined in the module but never used in forward().

    tile_n = _choose_tile_n(N)
    x_p, ahat_p, assign_p = prepare_graph(x, adj, assign, tile_n)
    params_p = prepare_params(raw_params)

    out_p = ginconvnet_forward(x_p, ahat_p, assign_p, params_p, tile_n=tile_n)
    out_p = jax.block_until_ready(out_p)
    out = np.asarray(out_p)[:B, :OUT_DIM]
    assert out.shape == (B, OUT_DIM) and np.all(np.isfinite(out))

    ref = np.asarray(reference_forward(x, adj, assign, raw_params))
    np.testing.assert_allclose(out, ref, rtol=2e-2, atol=2e-2)

    print("KERNEL_OK")
</pallas_src>

<mosaic_0001>
module attributes {stable_mosaic.version = 11 : i64} {
  func.func @_pool_fc_kernel(%arg0: i32, %arg1: memref<16x128xf32, #tpu.memory_space<vmem>>, %arg2: memref<8x16xbf16, #tpu.memory_space<vmem>>, %arg3: memref<128x384xbf16, #tpu.memory_space<vmem>>, %arg4: memref<1x384xf32, #tpu.memory_space<vmem>>, %arg5: memref<8x384xf32, #tpu.memory_space<vmem>>) attributes {dimension_semantics = [#tpu.dimension_semantics<arbitrary>], iteration_bounds = array<i64: 1>, scalar_prefetch = 0 : i64, scratch_operands = 0 : i64, tpu.core_type = #tpu.core_type<tc>, window_params = [{pipeline_mode = #tpu.pipeline_mode<synchronous>, transform_indices = @transform_0, window_bounds = array<i64: 16, 128>}, {pipeline_mode = #tpu.pipeline_mode<synchronous>, transform_indices = @transform_1, window_bounds = array<i64: 8, 16>}, {pipeline_mode = #tpu.pipeline_mode<synchronous>, transform_indices = @transform_2, window_bounds = array<i64: 128, 384>}, {pipeline_mode = #tpu.pipeline_mode<synchronous>, transform_indices = @transform_3, window_bounds = array<i64: 1, 384>}, {pipeline_mode = #tpu.pipeline_mode<synchronous>, transform_indices = @transform_4, window_bounds = array<i64: 8, 384>}]} {
    %c0 = arith.constant 0 : index
    %c0_0 = arith.constant 0 : index
    %0 = vector.load %arg2[%c0, %c0_0] : memref<8x16xbf16, #tpu.memory_space<vmem>>, vector<8x16xbf16>
    %c0_1 = arith.constant 0 : index
    %c0_2 = arith.constant 0 : index
    %1 = vector.load %arg1[%c0_1, %c0_2] : memref<16x128xf32, #tpu.memory_space<vmem>>, vector<16x128xf32>
    %2 = arith.truncf %1 : vector<16x128xf32> to vector<16x128xbf16>
    %cst = arith.constant dense<0.000000e+00> : vector<8x128xf32>
    %3 = tpu.matmul %0, %2, %cst {dimension_numbers = #tpu.dot_dimension_numbers<[1], [0], [0], [1], [0, 0, 1, 1], [], []>} : vector<8x16xbf16>, vector<16x128xbf16>, vector<8x128xf32> -> vector<8x128xf32>
    %4 = arith.truncf %3 : vector<8x128xf32> to vector<8x128xbf16>
    %c0_3 = arith.constant 0 : index
    %c0_4 = arith.constant 0 : index
    %5 = vector.load %arg3[%c0_3, %c0_4] : memref<128x384xbf16, #tpu.memory_space<vmem>>, vector<128x384xbf16>
    %cst_5 = arith.constant dense<0.000000e+00> : vector<8x384xf32>
    %6 = tpu.matmul %4, %5, %cst_5 {dimension_numbers = #tpu.dot_dimension_numbers<[1], [0], [0], [1], [0, 0, 1, 1], [], []>} : vector<8x128xbf16>, vector<128x384xbf16>, vector<8x384xf32> -> vector<8x384xf32>
    %c0_6 = arith.constant 0 : index
    %c0_7 = arith.constant 0 : index
    %7 = vector.load %arg4[%c0_6, %c0_7] : memref<1x384xf32, #tpu.memory_space<vmem>>, vector<1x384xf32>
    %8 = vector.broadcast %7 : vector<1x384xf32> to vector<8x384xf32>
    %9 = arith.addf %6, %8 : vector<8x384xf32>
    %cst_8 = arith.constant 0.000000e+00 : f32
    %10 = vector.broadcast %cst_8 : f32 to vector<8x384xf32>
    %11 = arith.maximumf %9, %10 : vector<8x384xf32>
    %c0_9 = arith.constant 0 : index
    %c0_10 = arith.constant 0 : index
    %12 = vector.load %arg5[%c0_9, %c0_10] : memref<8x384xf32, #tpu.memory_space<vmem>>, vector<8x384xf32>
    tpu.vector_store %arg5[%c0_9, %c0_10], %11 {strides = array<i32>} : memref<8x384xf32, #tpu.memory_space<vmem>>, vector<8x384xf32>,
    return
  }
  func.func @transform_0(%arg0: i32) -> (i32, i32) {
    %c0_i32 = arith.constant 0 : i32
    %c0_i32_0 = arith.constant 0 : i32
    %c0_i32_1 = arith.constant 0 : i32
    return %c0_i32, %c0_i32_0 : i32, i32
  }
  func.func @transform_1(%arg0: i32) -> (i32, i32) {
    %c0_i32 = arith.constant 0 : i32
    %c0_i32_0 = arith.constant 0 : i32
    %c0_i32_1 = arith.constant 0 : i32
    return %c0_i32, %c0_i32_0 : i32, i32
  }
  func.func @transform_2(%arg0: i32) -> (i32, i32) {
    %c0_i32 = arith.constant 0 : i32
    %c0_i32_0 = arith.constant 0 : i32
    %c0_i32_1 = arith.constant 0 : i32
    return %c0_i32, %c0_i32_0 : i32, i32
  }
  func.func @transform_3(%arg0: i32) -> (i32, i32) {
    %c0_i32 = arith.constant 0 : i32
    %c0_i32_0 = arith.constant 0 : i32
    %c0_i32_1 = arith.constant 0 : i32
    return %c0_i32, %c0_i32_0 : i32, i32
  }
  func.func @transform_4(%arg0: i32) -> (i32, i32) {
    %c0_i32 = arith.constant 0 : i32
    %c0_i32_0 = arith.constant 0 : i32
    %c0_i32_1 = arith.constant 0 : i32
    return %c0_i32, %c0_i32_0 : i32, i32
  }
}

module attributes {stable_mosaic.version = 11 : i64} {
  func.func @_gin_layer_kernel(%arg0: i32, %arg1: memref<8x16xbf16, #tpu.memory_space<vmem>>, %arg2: memref<16x128xf32, #tpu.memory_space<vmem>>, %arg3: memref<128x128xbf16, #tpu.memory_space<vmem>>, %arg4: memref<1x128xf32, #tpu.memory_space<vmem>>, %arg5: memref<128x128xbf16, #tpu.memory_space<vmem>>, %arg6: memref<1x128xf32, #tpu.memory_space<vmem>>, %arg7: memref<1x128xf32, #tpu.memory_space<vmem>>, %arg8: memref<1x128xf32, #tpu.memory_space<vmem>>, %arg9: memref<8x128xf32, #tpu.memory_space<vmem>>) attributes {dimension_semantics = [#tpu.dimension_semantics<parallel>], iteration_bounds = array<i64: 2>, scalar_prefetch = 0 : i64, scratch_operands = 0 : i64, tpu.core_type = #tpu.core_type<tc>, window_params = [{transform_indices = @transform_0, window_bounds = array<i64: 8, 16>}, {pipeline_mode = #tpu.pipeline_mode<synchronous>, transform_indices = @transform_1, window_bounds = array<i64: 16, 128>}, {pipeline_mode = #tpu.pipeline_mode<synchronous>, transform_indices = @transform_2, window_bounds = array<i64: 128, 128>}, {pipeline_mode = #tpu.pipeline_mode<synchronous>, transform_indices = @transform_3, window_bounds = array<i64: 1, 128>}, {pipeline_mode = #tpu.pipeline_mode<synchronous>, transform_indices = @transform_4, window_bounds = array<i64: 128, 128>}, {pipeline_mode = #tpu.pipeline_mode<synchronous>, transform_indices = @transform_5, window_bounds = array<i64: 1, 128>}, {pipeline_mode = #tpu.pipeline_mode<synchronous>, transform_indices = @transform_6, window_bounds = array<i64: 1, 128>}, {pipeline_mode = #tpu.pipeline_mode<synchronous>, transform_indices = @transform_7, window_bounds = array<i64: 1, 128>}, {transform_indices = @transform_8, window_bounds = array<i64: 8, 128>}]} {
    %c0 = arith.constant 0 : index
    %c0_0 = arith.constant 0 : index
    %0 = vector.load %arg1[%c0, %c0_0] : memref<8x16xbf16, #tpu.memory_space<vmem>>, vector<8x16xbf16>
    %c0_1 = arith.constant 0 : index
    %c0_2 = arith.constant 0 : index
    %1 = vector.load %arg2[%c0_1, %c0_2] : memref<16x128xf32, #tpu.memory_space<vmem>>, vector<16x128xf32>
    %2 = arith.truncf %1 : vector<16x128xf32> to vector<16x128xbf16>
    %cst = arith.constant dense<0.000000e+00> : vector<8x128xf32>
    %3 = tpu.matmul %0, %2, %cst {dimension_numbers = #tpu.dot_dimension_numbers<[1], [0], [0], [1], [0, 0, 1, 1], [], []>} : vector<8x16xbf16>, vector<16x128xbf16>, vector<8x128xf32> -> vector<8x128xf32>
    %4 = arith.truncf %3 : vector<8x128xf32> to vector<8x128xbf16>
    %c0_3 = arith.constant 0 : index
    %c0_4 = arith.constant 0 : index
    %5 = vector.load %arg3[%c0_3, %c0_4] : memref<128x128xbf16, #tpu.memory_space<vmem>>, vector<128x128xbf16>
    %cst_5 = arith.constant dense<0.000000e+00> : vector<8x128xf32>
    %6 = tpu.matmul %4, %5, %cst_5 {dimension_numbers = #tpu.dot_dimension_numbers<[1], [0], [0], [1], [0, 0, 1, 1], [], []>} : vector<8x128xbf16>, vector<128x128xbf16>, vector<8x128xf32> -> vector<8x128xf32>
    %c0_6 = arith.constant 0 : index
    %c0_7 = arith.constant 0 : index
    %7 = vector.load %arg4[%c0_6, %c0_7] : memref<1x128xf32, #tpu.memory_space<vmem>>, vector<1x128xf32>
    %8 = vector.broadcast %7 : vector<1x128xf32> to vector<8x128xf32>
    %9 = arith.addf %6, %8 : vector<8x128xf32>
    %cst_8 = arith.constant 0.000000e+00 : f32
    %10 = vector.broadcast %cst_8 : f32 to vector<8x128xf32>
    %11 = arith.maximumf %9, %10 : vector<8x128xf32>
    %12 = arith.truncf %11 : vector<8x128xf32> to vector<8x128xbf16>
    %c0_9 = arith.constant 0 : index
    %c0_10 = arith.constant 0 : index
    %13 = vector.load %arg5[%c0_9, %c0_10] : memref<128x128xbf16, #tpu.memory_space<vmem>>, vector<128x128xbf16>
    %cst_11 = arith.constant dense<0.000000e+00> : vector<8x128xf32>
    %14 = tpu.matmul %12, %13, %cst_11 {dimension_numbers = #tpu.dot_dimension_numbers<[1], [0], [0], [1], [0, 0, 1, 1], [], []>} : vector<8x128xbf16>, vector<128x128xbf16>, vector<8x128xf32> -> vector<8x128xf32>
    %c0_12 = arith.constant 0 : index
    %c0_13 = arith.constant 0 : index
    %15 = vector.load %arg6[%c0_12, %c0_13] : memref<1x128xf32, #tpu.memory_space<vmem>>, vector<1x128xf32>
    %16 = vector.broadcast %15 : vector<1x128xf32> to vector<8x128xf32>
    %17 = arith.addf %14, %16 : vector<8x128xf32>
    %cst_14 = arith.constant 0.000000e+00 : f32
    %18 = vector.broadcast %cst_14 : f32 to vector<8x128xf32>
    %19 = arith.maximumf %17, %18 : vector<8x128xf32>
    %c0_15 = arith.constant 0 : index
    %c0_16 = arith.constant 0 : index
    %20 = vector.load %arg7[%c0_15, %c0_16] : memref<1x128xf32, #tpu.memory_space<vmem>>, vector<1x128xf32>
    %21 = vector.broadcast %20 : vector<1x128xf32> to vector<8x128xf32>
    %22 = arith.mulf %19, %21 : vector<8x128xf32>
    %c0_17 = arith.constant 0 : index
    %c0_18 = arith.constant 0 : index
    %23 = vector.load %arg8[%c0_17, %c0_18] : memref<1x128xf32, #tpu.memory_space<vmem>>, vector<1x128xf32>
    %24 = vector.broadcast %23 : vector<1x128xf32> to vector<8x128xf32>
    %25 = arith.addf %22, %24 : vector<8x128xf32>
    %c0_19 = arith.constant 0 : index
    %c0_20 = arith.constant 0 : index
    %26 = vector.load %arg9[%c0_19, %c0_20] : memref<8x128xf32, #tpu.memory_space<vmem>>, vector<8x128xf32>
    tpu.vector_store %arg9[%c0_19, %c0_20], %25 {strides = array<i32>} : memref<8x128xf32, #tpu.memory_space<vmem>>, vector<8x128xf32>,
    return
  }
  func.func @transform_0(%arg0: i32) -> (i32, i32) {
    %c0_i32 = arith.constant 0 : i32
    %c0_i32_0 = arith.constant 0 : i32
    return %arg0, %c0_i32 : i32, i32
  }
  func.func @transform_1(%arg0: i32) -> (i32, i32) {
    %c0_i32 = arith.constant 0 : i32
    %c0_i32_0 = arith.constant 0 : i32
    %c0_i32_1 = arith.constant 0 : i32
    return %c0_i32, %c0_i32_0 : i32, i32
  }
  func.func @transform_2(%arg0: i32) -> (i32, i32) {
    %c0_i32 = arith.constant 0 : i32
    %c0_i32_0 = arith.constant 0 : i32
    %c0_i32_1 = arith.constant 0 : i32
    return %c0_i32, %c0_i32_0 : i32, i32
  }
  func.func @transform_3(%arg0: i32) -> (i32, i32) {
    %c0_i32 = arith.constant 0 : i32
    %c0_i32_0 = arith.constant 0 : i32
    %c0_i32_1 = arith.constant 0 : i32
    return %c0_i32, %c0_i32_0 : i32, i32
  }
  func.func @transform_4(%arg0: i32) -> (i32, i32) {
    %c0_i32 = arith.constant 0 : i32
    %c0_i32_0 = arith.constant 0 : i32
    %c0_i32_1 = arith.constant 0 : i32
    return %c0_i32, %c0_i32_0 : i32, i32
  }
  func.func @transform_5(%arg0: i32) -> (i32, i32) {
    %c0_i32 = arith.constant 0 : i32
    %c0_i32_0 = arith.constant 0 : i32
    %c0_i32_1 = arith.constant 0 : i32
    return %c0_i32, %c0_i32_0 : i32, i32
  }
  func.func @transform_6(%arg0: i32) -> (i32, i32) {
    %c0_i32 = arith.constant 0 : i32
    %c0_i32_0 = arith.constant 0 : i32
    %c0_i32_1 = arith.constant 0 : i32
    return %c0_i32, %c0_i32_0 : i32, i32
  }
  func.func @transform_7(%arg0: i32) -> (i32, i32) {
    %c0_i32 = arith.constant 0 : i32
    %c0_i32_0 = arith.constant 0 : i32
    %c0_i32_1 = arith.constant 0 : i32
    return %c0_i32, %c0_i32_0 : i32, i32
  }
  func.func @transform_8(%arg0: i32) -> (i32, i32) {
    %c0_i32 = arith.constant 0 : i32
    %c0_i32_0 = arith.constant 0 : i32
    return %arg0, %c0_i32 : i32, i32
  }
}

module attributes {stable_mosaic.version = 11 : i64} {
  func.func @_gin_layer_kernel(%arg0: i32, %arg1: memref<8x16xbf16, #tpu.memory_space<vmem>>, %arg2: memref<16x128xf32, #tpu.memory_space<vmem>>, %arg3: memref<128x128xbf16, #tpu.memory_space<vmem>>, %arg4: memref<1x128xf32, #tpu.memory_space<vmem>>, %arg5: memref<128x128xbf16, #tpu.memory_space<vmem>>, %arg6: memref<1x128xf32, #tpu.memory_space<vmem>>, %arg7: memref<1x128xf32, #tpu.memory_space<vmem>>, %arg8: memref<1x128xf32, #tpu.memory_space<vmem>>, %arg9: memref<8x128xf32, #tpu.memory_space<vmem>>) attributes {dimension_semantics = [#tpu.dimension_semantics<parallel>], iteration_bounds = array<i64: 2>, scalar_prefetch = 0 : i64, scratch_operands = 0 : i64, tpu.core_type = #tpu.core_type<tc>, window_params = [{transform_indices = @transform_0, window_bounds = array<i64: 8, 16>}, {pipeline_mode = #tpu.pipeline_mode<synchronous>, transform_indices = @transform_1, window_bounds = array<i64: 16, 128>}, {pipeline_mode = #tpu.pipeline_mode<synchronous>, transform_indices = @transform_2, window_bounds = array<i64: 128, 128>}, {pipeline_mode = #tpu.pipeline_mode<synchronous>, transform_indices = @transform_3, window_bounds = array<i64: 1, 128>}, {pipeline_mode = #tpu.pipeline_mode<synchronous>, transform_indices = @transform_4, window_bounds = array<i64: 128, 128>}, {pipeline_mode = #tpu.pipeline_mode<synchronous>, transform_indices = @transform_5, window_bounds = array<i64: 1, 128>}, {pipeline_mode = #tpu.pipeline_mode<synchronous>, transform_indices = @transform_6, window_bounds = array<i64: 1, 128>}, {pipeline_mode = #tpu.pipeline_mode<synchronous>, transform_indices = @transform_7, window_bounds = array<i64: 1, 128>}, {transform_indices = @transform_8, window_bounds = array<i64: 8, 128>}]} {
    %c0 = arith.constant 0 : index
    %c0_0 = arith.constant 0 : index
    %0 = vector.load %arg1[%c0, %c0_0] : memref<8x16xbf16, #tpu.memory_space<vmem>>, vector<8x16xbf16>
    %c0_1 = arith.constant 0 : index
    %c0_2 = arith.constant 0 : index
    %1 = vector.load %arg2[%c0_1, %c0_2] : memref<16x128xf32, #tpu.memory_space<vmem>>, vector<16x128xf32>
    %2 = arith.truncf %1 : vector<16x128xf32> to vector<16x128xbf16>
    %cst = arith.constant dense<0.000000e+00> : vector<8x128xf32>
    %3 = tpu.matmul %0, %2, %cst {dimension_numbers = #tpu.dot_dimension_numbers<[1], [0], [0], [1], [0, 0, 1, 1], [], []>} : vector<8x16xbf16>, vector<16x128xbf16>, vector<8x128xf32> -> vector<8x128xf32>
    %4 = arith.truncf %3 : vector<8x128xf32> to vector<8x128xbf16>
    %c0_3 = arith.constant 0 : index
    %c0_4 = arith.constant 0 : index
    %5 = vector.load %arg3[%c0_3, %c0_4] : memref<128x128xbf16, #tpu.memory_space<vmem>>, vector<128x128xbf16>
    %cst_5 = arith.constant dense<0.000000e+00> : vector<8x128xf32>
    %6 = tpu.matmul %4, %5, %cst_5 {dimension_numbers = #tpu.dot_dimension_numbers<[1], [0], [0], [1], [0, 0, 1, 1], [], []>} : vector<8x128xbf16>, vector<128x128xbf16>, vector<8x128xf32> -> vector<8x128xf32>
    %c0_6 = arith.constant 0 : index
    %c0_7 = arith.constant 0 : index
    %7 = vector.load %arg4[%c0_6, %c0_7] : memref<1x128xf32, #tpu.memory_space<vmem>>, vector<1x128xf32>
    %8 = vector.broadcast %7 : vector<1x128xf32> to vector<8x128xf32>
    %9 = arith.addf %6, %8 : vector<8x128xf32>
    %cst_8 = arith.constant 0.000000e+00 : f32
    %10 = vector.broadcast %cst_8 : f32 to vector<8x128xf32>
    %11 = arith.maximumf %9, %10 : vector<8x128xf32>
    %12 = arith.truncf %11 : vector<8x128xf32> to vector<8x128xbf16>
    %c0_9 = arith.constant 0 : index
    %c0_10 = arith.constant 0 : index
    %13 = vector.load %arg5[%c0_9, %c0_10] : memref<128x128xbf16, #tpu.memory_space<vmem>>, vector<128x128xbf16>
    %cst_11 = arith.constant dense<0.000000e+00> : vector<8x128xf32>
    %14 = tpu.matmul %12, %13, %cst_11 {dimension_numbers = #tpu.dot_dimension_numbers<[1], [0], [0], [1], [0, 0, 1, 1], [], []>} : vector<8x128xbf16>, vector<128x128xbf16>, vector<8x128xf32> -> vector<8x128xf32>
    %c0_12 = arith.constant 0 : index
    %c0_13 = arith.constant 0 : index
    %15 = vector.load %arg6[%c0_12, %c0_13] : memref<1x128xf32, #tpu.memory_space<vmem>>, vector<1x128xf32>
    %16 = vector.broadcast %15 : vector<1x128xf32> to vector<8x128xf32>
    %17 = arith.addf %14, %16 : vector<8x128xf32>
    %cst_14 = arith.constant 0.000000e+00 : f32
    %18 = vector.broadcast %cst_14 : f32 to vector<8x128xf32>
    %19 = arith.maximumf %17, %18 : vector<8x128xf32>
    %c0_15 = arith.constant 0 : index
    %c0_16 = arith.constant 0 : index
    %20 = vector.load %arg7[%c0_15, %c0_16] : memref<1x128xf32, #tpu.memory_space<vmem>>, vector<1x128xf32>
    %21 = vector.broadcast %20 : vector<1x128xf32> to vector<8x128xf32>
    %22 = arith.mulf %19, %21 : vector<8x128xf32>
    %c0_17 = arith.constant 0 : index
    %c0_18 = arith.constant 0 : index
    %23 = vector.load %arg8[%c0_17, %c0_18] : memref<1x128xf32, #tpu.memory_space<vmem>>, vector<1x128xf32>
    %24 = vector.broadcast %23 : vector<1x128xf32> to vector<8x128xf32>
    %25 = arith.addf %22, %24 : vector<8x128xf32>
    %c0_19 = arith.constant 0 : index
    %c0_20 = arith.constant 0 : index
    %26 = vector.load %arg9[%c0_19, %c0_20] : memref<8x128xf32, #tpu.memory_space<vmem>>, vector<8x128xf32>
    tpu.vector_store %arg9[%c0_19, %c0_20], %25 {strides = array<i32>} : memref<8x128xf32, #tpu.memory_space<vmem>>, vector<8x128xf32>,
    return
  }
  func.func @transform_0(%arg0: i32) -> (i32, i32) {
    %c0_i32 = arith.constant 0 : i32
    %c0_i32_0 = arith.constant 0 : i32
    return %arg0, %c0_i32 : i32, i32
  }
  func.func @transform_1(%arg0: i32) -> (i32, i32) {
    %c0_i32 = arith.constant 0 : i32
    %c0_i32_0 = arith.constant 0 : i32
    %c0_i32_1 = arith.constant 0 : i32
    return %c0_i32, %c0_i32_0 : i32, i32
  }
  func.func @transform_2(%arg0: i32) -> (i32, i32) {
    %c0_i32 = arith.constant 0 : i32
    %c0_i32_0 = arith.constant 0 : i32
    %c0_i32_1 = arith.constant 0 : i32
    return %c0_i32, %c0_i32_0 : i32, i32
  }
  func.func @transform_3(%arg0: i32) -> (i32, i32) {
    %c0_i32 = arith.constant 0 : i32
    %c0_i32_0 = arith.constant 0 : i32
    %c0_i32_1 = arith.constant 0 : i32
    return %c0_i32, %c0_i32_0 : i32, i32
  }
  func.func @transform_4(%arg0: i32) -> (i32, i32) {
    %c0_i32 = arith.constant 0 : i32
    %c0_i32_0 = arith.constant 0 : i32
    %c0_i32_1 = arith.constant 0 : i32
    return %c0_i32, %c0_i32_0 : i32, i32
  }
  func.func @transform_5(%arg0: i32) -> (i32, i32) {
    %c0_i32 = arith.constant 0 : i32
    %c0_i32_0 = arith.constant 0 : i32
    %c0_i32_1 = arith.constant 0 : i32
    return %c0_i32, %c0_i32_0 : i32, i32
  }
  func.func @transform_6(%arg0: i32) -> (i32, i32) {
    %c0_i32 = arith.constant 0 : i32
    %c0_i32_0 = arith.constant 0 : i32
    %c0_i32_1 = arith.constant 0 : i32
    return %c0_i32, %c0_i32_0 : i32, i32
  }
  func.func @transform_7(%arg0: i32) -> (i32, i32) {
    %c0_i32 = arith.constant 0 : i32
    %c0_i32_0 = arith.constant 0 : i32
    %c0_i32_1 = arith.constant 0 : i32
    return %c0_i32, %c0_i32_0 : i32, i32
  }
  func.func @transform_8(%arg0: i32) -> (i32, i32) {
    %c0_i32 = arith.constant 0 : i32
    %c0_i32_0 = arith.constant 0 : i32
    return %arg0, %c0_i32 : i32, i32
  }
}

</mosaic_0001>

<bundles_post_ra>
// kernel: ginconvnet_forward.7
= control target key start
LH: loop header
LB: loop body
LE: loop exit
PB: predicated region body
PF: predicated region fallthrough
CT: control target
= control target key end

     0   :  { %s823_s27 = smov 0   ;;  %s933_s0 = inlined_call_operand.vmem [shape: bf16[16,16], index: 0, kind: input, shape index: {}]   ;;  %s934_s1 = inlined_call_operand.vmem [shape: f32[16,128], index: 1, kind: input, shape index: {}]   ;;  %s935_s2 = inlined_call_operand.vmem [shape: bf16[128,128], index: 2, kind: input, shape index: {}]   ;;  %s936_s3 = inlined_call_operand.vmem [shape: f32[1,128], index: 3, kind: input, shape index: {}]   ;;  %s937_s4 = inlined_call_operand.vmem [shape: bf16[128,128], index: 4, kind: input, shape index: {}]   ;;  %s938_s5 = inlined_call_operand.vmem [shape: f32[1,128], index: 5, kind: input, shape index: {}]   ;;  %s939_s6 = inlined_call_operand.vmem [shape: f32[1,128], index: 6, kind: input, shape index: {}]   ;;  %s940_s7 = inlined_call_operand.vmem [shape: f32[1,128], index: 7, kind: input, shape index: {}]   ;;  %s941_s8 = inlined_call_operand.vmem [shape: f32[16,128], index: 8, kind: output, shape index: {}]  }
   0x1 LB: > { %s646_s28 = sadd.s32 4294967295, %s774_s27   ;;  %p650_p0 = scmp.ge.s32.totalorder %s774_s27, 1  ;;  %s774_s27 = sphi %s823_s27, %s18_s27  }
   0x2   : > { %p261_p1 = scmp.lt.s32.totalorder %s774_s27, 3 }
   0x4   : > { %p262_p2 = pnand %p650_p0, %p261_p1 }
   0x5   : > { %p293_p3 = scmp.lt.s32.totalorder (!%p262_p2), %s646_s28, 1 }
   0x6   : > { %265 = sbr.rel (%p262_p2) target bundleno = 613 (0x265), region = 52 }
   0xb   : > { %v303_v0 = vld [vmem:[%s934_s1] sm:$0xff]  ;;  %v304_v1 = vld [vmem:[%s934_s1 + $0x8] sm:$0xff]  ;;  %v776_v2 = vmov 0.0   ;;  %vm777_vm0 = vmmov 0   ;;  %v752_v4 = vld [vmem:[%s935_s2 + $0x38] sm:$0xff]   ;;  %s943_s28 = smov (!%p293_p3, %s646_s28), 1 }
   0xc   : > { %696 = vmatprep.subr.bf16.mxu0 %v776_v2  ;;  %v305_v3 = vpack.c.bf16 %v304_v1, %v303_v0  ;;  %698 = vmatprep.mubr.msk.bf16.mxu0 %vm777_vm0, %v776_v2  ;;  %v753_v5 = vld [vmem:[%s935_s2 + $0x30] sm:$0xff]   ;;  %s651_s15 = sshll.u32 %s943_s28, 2  ;;  %vm306_vm1 = vcmask 130048   ;;  %v754_v7 = vld [vmem:[%s935_s2 + $0x28] sm:$0xff]   ;;  %v755_v8 = vld [vmem:[%s935_s2 + $0x20] sm:$0xff]   ;;  %s652_s13 = sshll.u32 %s943_s28, 3 }
   0xd   : > { %702 = vmatprep.subr.bf16.mxu1 %v776_v2  ;;  %718 = vmatprep.mubr.msk.bf16.mxu1 %vm777_vm0, %v776_v2  ;;  %s296_s18 = scalar_lea.vmem %s933_s0, %s651_s15  ;;  %v756_v9 = vld [vmem:[%s935_s2 + $0x18] sm:$0xff]   ;;  %v757_v10 = vld [vmem:[%s935_s2 + $0x10] sm:$0xff]   ;;  %v758_v11 = vld [vmem:[%s935_s2 + $0x8] sm:$0xff]  }
   0xe   : > { %697 = vmatpush3.bf16.msra.mxu0 %v305_v3  ;;  %703 = vmatpush3.bf16.msra.mxu1 %v752_v4  ;;  %v302_v6 = vld [vmem:[%s296_s18] sm:$0xf]  ;;  %v760_v13 = vld [vmem:[%s937_s4 + $0x38] sm:$0xff]   ;;  %v761_v14 = vld [vmem:[%s937_s4 + $0x30] sm:$0xff]   ;;  %s300_s18 = scalar_lea.vmem %s941_s8, %s652_s13 }
   0xf   : > { %704 = vmatprep.subr.bf16.mxu1 %v776_v2  ;;  %722 = vmatprep.subr.bf16.mxu0 %v776_v2  ;;  %v759_v12 = vld [vmem:[%s935_s2] sm:$0xff]   ;;  %v762_v15 = vld [vmem:[%s937_s4 + $0x28] sm:$0xff]   ;;  %v764_v17 = vld [vmem:[%s937_s4 + $0x18] sm:$0xff]  }
  0x10   : > { %v763_v16 = vld [vmem:[%s937_s4 + $0x20] sm:$0xff]   ;;  %v765_v18 = vld [vmem:[%s937_s4 + $0x10] sm:$0xff]   ;;  %v766_v24 = vld [vmem:[%s937_s4 + $0x8] sm:$0xff]  }
  0x11   : > { %699 = vmatmul.mubr.msk.bf16.vlgmr.msra.gmra.mxu0 %vm306_vm1, %v302_v6  ;;  %v767_v25 = vld [vmem:[%s937_s4] sm:$0xff]  }
  0x12   : > { %705 = vmatpush3.bf16.msra.mxu1 %v753_v5  ;;  %738 = vmatprep.mubr.msk.bf16.mxu0 %vm777_vm0, %v776_v2  ;;  %v654_v26 = vld [vmem:[%s936_s3] ss:$0 sm:$0xff] }
  0x13   : > { %706 = vmatprep.subr.bf16.mxu1 %v776_v2  ;;  %723 = vmatpush3.bf16.msra.mxu0 %v760_v13  ;;  %v663_v34 = vld [vmem:[%s938_s5] ss:$0 sm:$0xff] }
  0x14   : > { %724 = vmatprep.subr.bf16.mxu0 %v776_v2  ;;  %v672_v37 = vld [vmem:[%s939_s6] ss:$0 sm:$0xff] }
  0x15   : > { %v673_v40 = vld [vmem:[%s940_s7] ss:$0 sm:$0xff] }
  0x16   : > { %707 = vmatpush3.bf16.msra.mxu1 %v754_v7 }
  0x17   : > { %708 = vmatprep.subr.bf16.mxu1 %v776_v2  ;;  %725 = vmatpush3.bf16.msra.mxu0 %v761_v14 }
  0x18   : > { %726 = vmatprep.subr.bf16.mxu0 %v776_v2 }
  0x1a   : > { %709 = vmatpush3.bf16.msra.mxu1 %v755_v8 }
  0x1b   : > { %710 = vmatprep.subr.bf16.mxu1 %v776_v2  ;;  %727 = vmatpush3.bf16.msra.mxu0 %v762_v15 }
  0x1c   : > { %728 = vmatprep.subr.bf16.mxu0 %v776_v2 }
  0x1e   : > { %711 = vmatpush3.bf16.msra.mxu1 %v756_v9 }
  0x1f   : > { %712 = vmatprep.subr.bf16.mxu1 %v776_v2  ;;  %729 = vmatpush3.bf16.msra.mxu0 %v763_v16 }
  0x20   : > { %730 = vmatprep.subr.bf16.mxu0 %v776_v2 }
  0x22   : > { %713 = vmatpush3.bf16.msra.mxu1 %v757_v10 }
  0x23   : > { %714 = vmatprep.subr.bf16.mxu1 %v776_v2  ;;  %731 = vmatpush3.bf16.msra.mxu0 %v764_v17 }
  0x24   : > { %732 = vmatprep.subr.bf16.mxu0 %v776_v2 }
  0x26   : > { %715 = vmatpush3.bf16.msra.mxu1 %v758_v11 }
  0x27   : > { %716 = vmatprep.subr.bf16.mxu1 %v776_v2  ;;  %733 = vmatpush3.bf16.msra.mxu0 %v765_v18 }
  0x28   : > { %734 = vmatprep.subr.bf16.mxu0 %v776_v2 }
  0x2a   : > { %717 = vmatpush3.bf16.msra.mxu1 %v759_v12 }
  0x2b   : > { %735 = vmatpush3.bf16.msra.mxu0 %v766_v24 }
  0x2c   : > { %736 = vmatprep.subr.bf16.mxu0 %v776_v2 }
  0x2f   : > { %737 = vmatpush3.bf16.msra.mxu0 %v767_v25 }
  0xd1   : > { %v344_v19 = vpop.f32.mrf.mxu0 }
  0xd2   : > { %v350_v20 = vpack.c.bf16 %v344_v19, %v344_v19 }
  0xd3   : > { %v700_v21 = vpop.f32.mrf.mxu0 }
  0xd4   : > { %719 = vmatmul.mubr.bf16.vlgmr.msra.gmra.mxu1 %v350_v20 }
  0xd5   : > { %v347_v22 = vpop.f32.mrf.mxu0 }
  0xd7   : > { %v701_v23 = vpop.f32.mrf.mxu0 }
 0x194   : > { %v456_v27 = vpop.f32.mrf.mxu1 }
 0x195   : > { %v457_v28 = vadd.f32 %v654_v26, %v456_v27 }
 0x196   : > { %v720_v29 = vpop.f32.mrf.mxu1 }
 0x197   : > { %v462_v30 = vmax.f32 %v457_v28, 0.0 }
 0x198   : > { %v459_v31 = vpop.f32.mrf.mxu1 }
 0x199   : > { %v463_v32 = vpack.c.bf16 %v462_v30, %v462_v30 }
 0x19a   : > { %v721_v33 = vpop.f32.mrf.mxu1 }
 0x19b   : > { %739 = vmatmul.mubr.bf16.vlgmr.msra.gmra.mxu0 %v463_v32 }
 0x25b   : > { %v569_v35 = vpop.f32.mrf.mxu0 }
 0x25c   : > { %v570_v36 = vadd.f32 %v663_v34, %v569_v35 }
 0x25d   : > { %v740_v38 = vpop.f32.mrf.mxu0 }
 0x25e   : > { %v575_v39 = vmax.f32 %v570_v36, 0.0 }
 0x25f   : > { %v572_v41 = vpop.f32.mrf.mxu0 }
 0x260   : > { %v583_v42 = vmul.f32 %v672_v37, %v575_v39 }
 0x261   : > { %v741_v43 = vpop.f32.mrf.mxu0 }
 0x262   : > { %v591_v44 = vadd.f32 %v673_v40, %v583_v42 }
 0x264   : > { %592 = vst [vmem:[%s300_s18] sm:$0xff] %v591_v44 }
 0x265 PF: > { %s18_s27 = sadd.s32 1, %s774_s27  }
 0x266   : > { %p15_p4 = scmp.ge.s32.totalorder %s18_s27, 4  }
 0x268   :  { %17 = sbr.rel (!%p15_p4) target bundleno = 1 (0x1), region = 82 }

// kernel: ginconvnet_forward.11
= control target key start
LH: loop header
LB: loop body
LE: loop exit
PB: predicated region body
PF: predicated region fallthrough
CT: control target
= control target key end

     0   :  { %v466_v2 = vmov 0.0   ;;  %vm467_vm0 = vmmov 0   ;;  %vm23_vm1 = vcmask 130048   ;;  %s584_s0 = inlined_call_operand.vmem [shape: f32[16,128], index: 0, kind: input, shape index: {}]   ;;  %s585_s1 = inlined_call_operand.vmem [shape: bf16[8,16], index: 1, kind: input, shape index: {}]   ;;  %s586_s2 = inlined_call_operand.vmem [shape: bf16[128,384], index: 2, kind: input, shape index: {}]   ;;  %s587_s3 = inlined_call_operand.vmem [shape: f32[1,384], index: 3, kind: input, shape index: {}]   ;;  %s588_s4 = inlined_call_operand.hbm [shape: f32[8,384], index: 4, kind: output, shape index: {}]  }
   0x1   :  { %v20_v0 = vld [vmem:[%s584_s0] sm:$0xff]  ;;  %v21_v1 = vld [vmem:[%s584_s0 + $0x8] sm:$0xff]  ;;  %382 = vmatprep.subr.bf16.mxu0 %v466_v2  ;;  %384 = vmatprep.mubr.msk.bf16.mxu0 %vm467_vm0, %v466_v2  ;;  %v415_v7 = vld [vmem:[%s586_s2 + $0xb0] ss:$12 sps:$4 sm:$0xff]  }
   0x2   :  { %v22_v3 = vpack.c.bf16 %v21_v1, %v20_v0  ;;  %v19_v4 = vld [vmem:[%s585_s1] sm:$0xf]  ;;  %v412_v5 = vld [vmem:[%s586_s2 + $0xac] ss:$12 sps:$4 sm:$0xff]   ;;  %v414_v6 = vld [vmem:[%s586_s2 + $0xa8] ss:$12 sps:$4 sm:$0xff]  }
   0x3   :  { %245 = vmatprep.subr.bf16.mxu1 %v412_v5  ;;  %v416_v8 = vld [vmem:[%s586_s2 + $0x94] ss:$12 sps:$4 sm:$0xff]   ;;  %v418_v9 = vld [vmem:[%s586_s2 + $0x90] ss:$12 sps:$4 sm:$0xff]   ;;  %v419_v11 = vld [vmem:[%s586_s2 + $0x98] ss:$12 sps:$4 sm:$0xff]  }
   0x4   :  { %383 = vmatpush3.bf16.msra.mxu0 %v22_v3  ;;  %246 = vmatpush1.bf16.msra.mxu1 %v414_v6  ;;  %v420_v10 = vld [vmem:[%s586_s2 + $0x7c] ss:$12 sps:$4 sm:$0xff]   ;;  %v422_v12 = vld [vmem:[%s586_s2 + $0x78] ss:$12 sps:$4 sm:$0xff]   ;;  %v423_v14 = vld [vmem:[%s586_s2 + $0x80] ss:$12 sps:$4 sm:$0xff]  }
   0x5   :  { %388 = vmatprep.subr.bf16.mxu0 %v466_v2  ;;  %247 = vmatprep.subr.bf16.mxu1 %v416_v8  ;;  %v424_v13 = vld [vmem:[%s586_s2 + $0x64] ss:$12 sps:$4 sm:$0xff]   ;;  %v426_v15 = vld [vmem:[%s586_s2 + $0x60] ss:$12 sps:$4 sm:$0xff]   ;;  %v427_v17 = vld [vmem:[%s586_s2 + $0x68] ss:$12 sps:$4 sm:$0xff]  }
   0x6   :  { %v428_v16 = vld [vmem:[%s586_s2 + $0x4c] ss:$12 sps:$4 sm:$0xff]   ;;  %v430_v18 = vld [vmem:[%s586_s2 + $0x48] ss:$12 sps:$4 sm:$0xff]   ;;  %v431_v20 = vld [vmem:[%s586_s2 + $0x50] ss:$12 sps:$4 sm:$0xff]  }
   0x7   :  { %385 = vmatmul.mubr.msk.bf16.vlgmr.msra.gmra.mxu0 %vm23_vm1, %v19_v4  ;;  %v432_v19 = vld [vmem:[%s586_s2 + $0x34] ss:$12 sps:$4 sm:$0xff]  }
   0x8   :  { %389 = vmatpush3.bf16.msra.mxu0 %v415_v7  ;;  %404 = vmatprep.mubr.msk.bf16.mxu0 %vm467_vm0, %v466_v2 }
   0x9   :  { %390 = vmatprep.subr.bf16.mxu0 %v466_v2  ;;  %248 = vmatpush1.bf16.msra.mxu1 %v418_v9 }
   0xa   :  { %249 = vmatprep.subr.bf16.mxu1 %v420_v10 }
   0xc   :  { %391 = vmatpush3.bf16.msra.mxu0 %v419_v11 }
   0xd   :  { %392 = vmatprep.subr.bf16.mxu0 %v466_v2  ;;  %250 = vmatpush1.bf16.msra.mxu1 %v422_v12 }
   0xe   :  { %251 = vmatprep.subr.bf16.mxu1 %v424_v13 }
  0x10   :  { %393 = vmatpush3.bf16.msra.mxu0 %v423_v14 }
  0x11   :  { %394 = vmatprep.subr.bf16.mxu0 %v466_v2  ;;  %252 = vmatpush1.bf16.msra.mxu1 %v426_v15 }
  0x12   :  { %253 = vmatprep.subr.bf16.mxu1 %v428_v16 }
  0x14   :  { %395 = vmatpush3.bf16.msra.mxu0 %v427_v17 }
  0x15   :  { %9 = vsyncpa [#allocation3], 0  ;;  %396 = vmatprep.subr.bf16.mxu0 %v466_v2  ;;  %254 = vmatpush1.bf16.msra.mxu1 %v430_v18  ;;  %v434_v21 = vld [vmem:[%s586_s2 + $0x30] ss:$12 sps:$4 sm:$0xff]   ;;  %v435_v23 = vld [vmem:[%s586_s2 + $0x38] ss:$12 sps:$4 sm:$0xff]   ;;  %v102_v35 = vlaneseq }
  0x16   :  { %255 = vmatprep.subr.bf16.mxu1 %v432_v19  ;;  %v436_v22 = vld [vmem:[%s586_s2 + $0x1c] ss:$12 sps:$4 sm:$0xff]   ;;  %v438_v24 = vld [vmem:[%s586_s2 + $0x18] ss:$12 sps:$4 sm:$0xff]   ;;  %v439_v26 = vld [vmem:[%s586_s2 + $0x20] ss:$12 sps:$4 sm:$0xff]  }
  0x17   :  { %v440_v25 = vld [vmem:[%s586_s2 + $0x4] ss:$12 sps:$4 sm:$0xff]   ;;  %v442_v27 = vld [vmem:[%s586_s2] ss:$12 sps:$4 sm:$0xff]   ;;  %v443_v28 = vld [vmem:[%s586_s2 + $0x8] ss:$12 sps:$4 sm:$0xff]  }
  0x18   :  { %397 = vmatpush3.bf16.msra.mxu0 %v431_v20  ;;  %v468_v29 = vmov 0   ;;  %v103_v36 = vshrl.u32 %v102_v35, 7  ;;  %v100_v39 = vld [vmem:[%s587_s3] sm:$0x7]  ;;  %s469_s2 = smov [#allocation2]  }
  0x19   :  { %398 = vmatprep.subr.bf16.mxu0 %v466_v2  ;;  %256 = vmatpush1.bf16.msra.mxu1 %v434_v21  ;;  %s338_s15 = sshll.u32 %s469_s2, 4  ;;  %s339_s15 = int_to_ptr.vmem [resolvable:$true] %s338_s15 }
  0x1a   :  { %257 = vmatprep.subr.bf16.mxu1 %v436_v22  ;;  %277 = vmatprep.mubr.bf16.mxu1 %v468_v29  ;;  %v104_v37 = vsub.s32 0, %v103_v36  ;;  %v112_v38 = vsub.s32 2, %v103_v36  ;;  %v108_v40 = vsub.s32 1, %v103_v36  ;;  %s444_s3 = scalar_lea.vmem %s339_s15, 384  ;;  %p449_p1 = scmp.lt.s32.totalorder %s339_s15, %s339_s15 }
  0x1b   :  { %p445_p0 = scmp.ne.s32.totalorder %s339_s15, %s444_s3  ;;  %p450_p2 = scmp.lt.s32.totalorder %s444_s3, %s444_s3 }
  0x1c   :  { %399 = vmatpush3.bf16.msra.mxu0 %v435_v23  ;;  %v105_v41 = vrot.slane %v100_v39, %v104_v37  ;;  %v113_v42 = vrot.slane %v100_v39, %v112_v38  ;;  %v109_v43 = vrot.slane %v100_v39, %v108_v40 }
  0x1d   :  { %400 = vmatprep.subr.bf16.mxu0 %v466_v2  ;;  %258 = vmatpush1.bf16.msra.mxu1 %v438_v24  ;;  %p451_p3 = por %p450_p2, %p449_p1 }
  0x1e   :  { %259 = vmatprep.subr.bf16.mxu1 %v440_v25 }
  0x1f   :  { %p452_p4 = pnand %p451_p3, %p445_p0 }
  0x20   :  { %401 = vmatpush3.bf16.msra.mxu0 %v439_v26 }
  0x21   :  { %402 = vmatprep.subr.bf16.mxu0 %v466_v2  ;;  %260 = vmatpush1.bf16.msra.mxu1 %v442_v27 }
  0x24   :  { %403 = vmatpush3.bf16.msra.mxu0 %v443_v28 }
  0xc7   :  { %v61_v30 = vpop.f32.mrf.mxu0 }
  0xc8   :  { %v67_v31 = vpack.c.bf16 %v61_v30, %v61_v30 }
  0xc9   :  { %v386_v32 = vpop.f32.mrf.mxu0 }
  0xca   :  { %278 = vmatmul.mubr.bf16.vlgmr.msra.gmra.mxu1 %v67_v31  ;;  %405 = vmatmul.mubr.bf16.vlgmr.msra.gmra.mxu0 %v67_v31 }
  0xcb   :  { %v64_v33 = vpop.f32.mrf.mxu0 }
  0xcd   :  { %v387_v34 = vpop.f32.mrf.mxu0 }
 0x18a   :  { %v279_v44 = vpop.f32.mrf.mxu1  ;;  %v320_v45 = vpop.f32.mrf.mxu0 }
 0x18b   :  { %v280_v46 = vadd.f32 %v279_v44, %v105_v41  ;;  %v321_v47 = vadd.f32 %v320_v45, %v113_v42 }
 0x18c   :  { %v281_v48 = vpop.f32.mrf.mxu1  ;;  %v406_v49 = vpop.f32.mrf.mxu0 }
 0x18d   :  { %v326_v50 = vmax.f32 %v280_v46, 0.0  ;;  %v328_v51 = vmax.f32 %v321_v47, 0.0  ;;  %v282_v52 = vadd.f32 %v281_v48, %v109_v43 }
 0x18e   :  { %v283_v53 = vpop.f32.mrf.mxu1  ;;  %v323_v54 = vpop.f32.mrf.mxu0 }
 0x18f   :  { %329 = vst [vmem:[#allocation2] sm:$0xff] %v326_v50  ;;  %331 = vst [vmem:[#allocation2 + $0x10] sm:$0xff] %v328_v51  ;;  %v327_v55 = vmax.f32 %v282_v52, 0.0 }
 0x190   :  { %v284_v56 = vpop.f32.mrf.mxu1  ;;  %v407_v57 = vpop.f32.mrf.mxu0 }
 0x191   :  { %330 = vst [vmem:[#allocation2 + $0x8] sm:$0xff] %v327_v55 }
 0x192   :  { %455 = shalt.err (!%p452_p4)
}
 0x193   :  { %341 = dma.vmem_to_hbm [thread:$0]  %s339_s15, 384, %s588_s4, [#allocation3]  }
 0x194   :  { %464 = dma.done.wait [#allocation3], 384  }
 0x195   :  { %465 = vsyncadd [#allocation3], 4294966912 }
 0x196   :  { %345 = vsyncpa [#allocation3], 1 }

// kernel: ginconvnet_forward.6
= control target key start
LH: loop header
LB: loop body
LE: loop exit
PB: predicated region body
PF: predicated region fallthrough
CT: control target
= control target key end

     0   :  { %13 = vsyncpa [#allocation3], 0  ;;  %s1151_s0 = inlined_call_operand.vmem [shape: bf16[16,16], index: 0, kind: input, shape index: {}]   ;;  %s1152_s1 = inlined_call_operand.hbm [shape: f32[16,128], index: 1, kind: input, shape index: {}]   ;;  %s1153_s2 = inlined_call_operand.hbm [shape: bf16[128,128], index: 2, kind: input, shape index: {}]   ;;  %s1154_s3 = inlined_call_operand.vmem [shape: f32[1,128], index: 3, kind: input, shape index: {}]   ;;  %s1155_s4 = inlined_call_operand.hbm [shape: bf16[128,128], index: 4, kind: input, shape index: {}]   ;;  %s1156_s5 = inlined_call_operand.vmem [shape: f32[1,128], index: 5, kind: input, shape index: {}]   ;;  %s1157_s6 = inlined_call_operand.vmem [shape: f32[1,128], index: 6, kind: input, shape index: {}]   ;;  %s1158_s7 = inlined_call_operand.vmem [shape: f32[1,128], index: 7, kind: input, shape index: {}]   ;;  %s1159_s8 = inlined_call_operand.vmem [shape: f32[16,128], index: 8, kind: output, shape index: {}]  }
   0x1   :  { %14 = vsyncpa [#allocation5], 0  ;;  %s1032_s27 = smov 0  }
   0x2 LB: > { %s978_s28 = smov [#allocation4]   ;;  %s1038_s30 = sadd.s32 4294967295, %s976_s27   ;;  %s976_s27 = sphi %s1032_s27, %s20_s27  }
   0x3   : > { %s249_s29 = sshll.u32 %s978_s28, 4  ;;  %p723_p0 = scmp.ge.s32.totalorder %s976_s27, 1  ;;  %s250_s29 = int_to_ptr.vmem [resolvable:$true] %s249_s29 }
   0x4   : > { %p224_p1 = scmp.lt.s32.totalorder %s976_s27, 3  ;;  %p845_p2 = scmp.eq.s32.totalorder %s1038_s30, 0 }
   0x5   : > { %s979_s10 = smov [#allocation2]   ;;  %s980_s13 = smov [#allocation6]  }
   0x6   : > { %p1043_p3 = pnand %p723_p0, %p224_p1  ;;  %s236_s11 = sshll.u32 %s979_s10, 4  ;;  %s1049_s11 = int_to_ptr.vmem [resolvable:$true] %s236_s11 }
   0x7   : > { %s1057_s14 = sshll.u32 %s980_s13, 4  ;;  %s895_s15 = scalar_lea.vmem %s250_s29, 1024  ;;  %s266_s14 = int_to_ptr.vmem [resolvable:$true] %s1057_s14 }
   0x8   : > { %p835_p4 = pneg %p1043_p3  ;;  %p896_p7 = scmp.ne.s32.totalorder %s250_s29, %s895_s15 }
   0x9   : > { %p903_p10 = scmp.lt.s32.totalorder %s250_s29, %s250_s29  ;;  %p904_p11 = scmp.lt.s32.totalorder %s895_s15, %s895_s15 }
   0xa   : > { %p1053_p5 = pnand %p845_p2, %p835_p4 }
   0xb   : > { %p905_p12 = por %p904_p11, %p903_p10 }
   0xc   : > { %p886_p6 = pneg %p1053_p5 }
   0xe   : > { %p898_p8 = pnand %p896_p7, %p886_p6 }
  0x10   : > { %p899_p9 = pneg %p898_p8 }
  0x12   : > { %p906_p13 = pnand %p905_p12, %p899_p9 }
  0x14   : > { %909 = shalt.err (!%p906_p13)
}
  0x15   : > { %s981_s16 = smov 64   ;;  %s982_s17 = smov 4  }
  0x16   : > { %841 = dma.hbm_to_vmem [thread:$0]  (!%p1053_p5), %s1153_s2, 1024, %s250_s29, [#allocation5], %s981_s16, %s981_s16, %s982_s17  }
  0x17   : > { %s921_s20 = scalar_lea.vmem %s1049_s11, 256  ;;  %p929_p7 = scmp.lt.s32.totalorder %s1049_s11, %s1049_s11 }
  0x18   : > { %p922_p0 = scmp.ne.s32.totalorder %s1049_s11, %s921_s20  ;;  %p930_p8 = scmp.lt.s32.totalorder %s921_s20, %s921_s20 }
  0x1a   : > { %p924_p1 = pnand %p922_p0, %p886_p6  ;;  %p931_p9 = por %p930_p8, %p929_p7 }
  0x1c   : > { %p925_p4 = pneg %p924_p1 }
  0x1e   : > { %p932_p10 = pnand %p931_p9, %p925_p4 }
  0x20   : > { %935 = shalt.err (!%p932_p10)
}
  0x21   : > { %s983_s21 = smov 128   ;;  %s984_s22 = smov 8  }
  0x22   : > { %838 = dma.hbm_to_vmem [thread:$0]  (!%p1053_p5), %s1152_s1, 256, %s1049_s11, [#allocation3], %s983_s21, %s983_s21, %s984_s22  }
  0x23   : > { %s947_s25 = scalar_lea.vmem %s266_s14, 1024  ;;  %p955_p0 = scmp.lt.s32.totalorder %s266_s14, %s266_s14 }
  0x24   : > { %p948_p11 = scmp.ne.s32.totalorder %s266_s14, %s947_s25  ;;  %p956_p1 = scmp.lt.s32.totalorder %s947_s25, %s947_s25 }
  0x26   : > { %p950_p12 = pnand %p948_p11, %p886_p6  ;;  %p957_p4 = por %p956_p1, %p955_p0 }
  0x28   : > { %p951_p13 = pneg %p950_p12 }
  0x2a   : > { %p958_p7 = pnand %p957_p4, %p951_p13 }
  0x2c   : > { %961 = shalt.err (!%p958_p7)
}
  0x2d   : > { %844 = dma.hbm_to_vmem [thread:$0]  (!%p1053_p5), %s1155_s4, 1024, %s266_s14, [#allocation5], %s981_s16, %s981_s16, %s982_s17  }
  0x2e   : > { %297 = sbr.rel (%p1043_p3) target bundleno = 657 (0x291), region = 52 }
  0x33   : > { %967 = dma.done.wait (%p845_p2), [#allocation3], 256  }
  0x34   : > { %969 = vsyncadd (%p845_p2), [#allocation3], 4294967040 }
  0x35   : > { %971 = dma.done.wait (%p845_p2), [#allocation5], 2048  }
  0x36   : > { %973 = vsyncadd (%p845_p2), [#allocation5], 4294965248  ;;  %p337_p6 = scmp.lt.s32.totalorder %s1038_s30, 1  ;;  %v985_v0 = vmov 0.0   ;;  %vm986_vm0 = vmmov 0   ;;  %v347_v1 = vld [vmem:[#allocation2] sm:$0xff] }
  0x37   : > { %777 = vmatprep.subr.bf16.mxu0 %v985_v0  ;;  %779 = vmatprep.mubr.msk.bf16.mxu0 %vm986_vm0, %v985_v0  ;;  %v348_v2 = vld [vmem:[#allocation2 + $0x8] sm:$0xff]  ;;  %vm350_vm1 = vcmask 130048   ;;  %v869_v6 = vld [vmem:[#allocation4 + $0x30] sm:$0xff]   ;;  %v870_v7 = vld [vmem:[#allocation4 + $0x28] sm:$0xff]  }
  0x38   : > { %s1163_s30 = smov (!%p337_p6, %s1038_s30), 1  ;;  %783 = vmatprep.subr.bf16.mxu1 %v985_v0  ;;  %799 = vmatprep.mubr.msk.bf16.mxu1 %vm986_vm0, %v985_v0  ;;  %v349_v3 = vpack.c.bf16 %v348_v2, %v347_v1  ;;  %v868_v4 = vld [vmem:[#allocation4 + $0x38] sm:$0xff]   ;;  %v871_v8 = vld [vmem:[#allocation4 + $0x20] sm:$0xff]   ;;  %v873_v10 = vld [vmem:[#allocation4 + $0x10] sm:$0xff]  }
  0x39   : > { %s732_s29 = sshll.u32 %s1163_s30, 2  ;;  %784 = vmatpush3.bf16.msra.mxu1 %v868_v4  ;;  %v872_v9 = vld [vmem:[#allocation4 + $0x18] sm:$0xff]   ;;  %v874_v11 = vld [vmem:[#allocation4 + $0x8] sm:$0xff]   ;;  %v875_v12 = vld [vmem:[#allocation4] sm:$0xff]   ;;  %s733_s18 = sshll.u32 %s1163_s30, 3 }
  0x3a   : > { %s340_s11 = scalar_lea.vmem %s1151_s0, %s732_s29  ;;  %778 = vmatpush3.bf16.msra.mxu0 %v349_v3  ;;  %785 = vmatprep.subr.bf16.mxu1 %v985_v0  ;;  %v876_v13 = vld [vmem:[#allocation6 + $0x38] sm:$0xff]   ;;  %v877_v14 = vld [vmem:[#allocation6 + $0x30] sm:$0xff]   ;;  %v878_v15 = vld [vmem:[#allocation6 + $0x28] sm:$0xff]   ;;  %s344_s23 = scalar_lea.vmem %s1159_s8, %s733_s18 }
  0x3b   : > { %v346_v5 = vld [vmem:[%s340_s11] sm:$0xf]  ;;  %803 = vmatprep.subr.bf16.mxu0 %v985_v0  ;;  %v879_v16 = vld [vmem:[#allocation6 + $0x20] sm:$0xff]   ;;  %v880_v17 = vld [vmem:[#allocation6 + $0x18] sm:$0xff]  }
  0x3c   : > { %v881_v18 = vld [vmem:[#allocation6 + $0x10] sm:$0xff]   ;;  %v882_v24 = vld [vmem:[#allocation6 + $0x8] sm:$0xff]   ;;  %v883_v25 = vld [vmem:[#allocation6] sm:$0xff]  }
  0x3d   : > { %780 = vmatmul.mubr.msk.bf16.vlgmr.msra.gmra.mxu0 %vm350_vm1, %v346_v5  ;;  %786 = vmatpush3.bf16.msra.mxu1 %v869_v6  ;;  %v735_v26 = vld [vmem:[%s1154_s3] ss:$0 sm:$0xff] }
  0x3e   : > { %819 = vmatprep.mubr.msk.bf16.mxu0 %vm986_vm0, %v985_v0  ;;  %787 = vmatprep.subr.bf16.mxu1 %v985_v0  ;;  %v744_v34 = vld [vmem:[%s1156_s5] ss:$0 sm:$0xff] }
  0x3f   : > { %804 = vmatpush3.bf16.msra.mxu0 %v876_v13  ;;  %v753_v37 = vld [vmem:[%s1157_s6] ss:$0 sm:$0xff] }
  0x40   : > { %805 = vmatprep.subr.bf16.mxu0 %v985_v0  ;;  %v754_v40 = vld [vmem:[%s1158_s7] ss:$0 sm:$0xff] }
  0x41   : > { %788 = vmatpush3.bf16.msra.mxu1 %v870_v7 }
  0x42   : > { %789 = vmatprep.subr.bf16.mxu1 %v985_v0 }
  0x43   : > { %806 = vmatpush3.bf16.msra.mxu0 %v877_v14 }
  0x44   : > { %807 = vmatprep.subr.bf16.mxu0 %v985_v0 }
  0x45   : > { %790 = vmatpush3.bf16.msra.mxu1 %v871_v8 }
  0x46   : > { %791 = vmatprep.subr.bf16.mxu1 %v985_v0 }
  0x47   : > { %808 = vmatpush3.bf16.msra.mxu0 %v878_v15 }
  0x48   : > { %809 = vmatprep.subr.bf16.mxu0 %v985_v0 }
  0x49   : > { %792 = vmatpush3.bf16.msra.mxu1 %v872_v9 }
  0x4a   : > { %793 = vmatprep.subr.bf16.mxu1 %v985_v0 }
  0x4b   : > { %810 = vmatpush3.bf16.msra.mxu0 %v879_v16 }
  0x4c   : > { %811 = vmatprep.subr.bf16.mxu0 %v985_v0 }
  0x4d   : > { %794 = vmatpush3.bf16.msra.mxu1 %v873_v10 }
  0x4e   : > { %795 = vmatprep.subr.bf16.mxu1 %v985_v0 }
  0x4f   : > { %812 = vmatpush3.bf16.msra.mxu0 %v880_v17 }
  0x50   : > { %813 = vmatprep.subr.bf16.mxu0 %v985_v0 }
  0x51   : > { %796 = vmatpush3.bf16.msra.mxu1 %v874_v11 }
  0x52   : > { %797 = vmatprep.subr.bf16.mxu1 %v985_v0 }
  0x53   : > { %814 = vmatpush3.bf16.msra.mxu0 %v881_v18 }
  0x54   : > { %815 = vmatprep.subr.bf16.mxu0 %v985_v0 }
  0x55   : > { %798 = vmatpush3.bf16.msra.mxu1 %v875_v12 }
  0x57   : > { %816 = vmatpush3.bf16.msra.mxu0 %v882_v24 }
  0x58   : > { %817 = vmatprep.subr.bf16.mxu0 %v985_v0 }
  0x5b   : > { %818 = vmatpush3.bf16.msra.mxu0 %v883_v25 }
  0xfd   : > { %v388_v19 = vpop.f32.mrf.mxu0 }
  0xfe   : > { %v394_v20 = vpack.c.bf16 %v388_v19, %v388_v19 }
  0xff   : > { %v781_v21 = vpop.f32.mrf.mxu0 }
 0x100   : > { %800 = vmatmul.mubr.bf16.vlgmr.msra.gmra.mxu1 %v394_v20 }
 0x101   : > { %v391_v22 = vpop.f32.mrf.mxu0 }
 0x103   : > { %v782_v23 = vpop.f32.mrf.mxu0 }
 0x1c0   : > { %v500_v27 = vpop.f32.mrf.mxu1 }
 0x1c1   : > { %v501_v28 = vadd.f32 %v735_v26, %v500_v27 }
 0x1c2   : > { %v801_v29 = vpop.f32.mrf.mxu1 }
 0x1c3   : > { %v506_v30 = vmax.f32 %v501_v28, 0.0 }
 0x1c4   : > { %v503_v31 = vpop.f32.mrf.mxu1 }
 0x1c5   : > { %v507_v32 = vpack.c.bf16 %v506_v30, %v506_v30 }
 0x1c6   : > { %v802_v33 = vpop.f32.mrf.mxu1 }
 0x1c7   : > { %820 = vmatmul.mubr.bf16.vlgmr.msra.gmra.mxu0 %v507_v32 }
 0x287   : > { %v613_v35 = vpop.f32.mrf.mxu0 }
 0x288   : > { %v614_v36 = vadd.f32 %v744_v34, %v613_v35 }
 0x289   : > { %v821_v38 = vpop.f32.mrf.mxu0 }
 0x28a   : > { %v619_v39 = vmax.f32 %v614_v36, 0.0 }
 0x28b   : > { %v616_v41 = vpop.f32.mrf.mxu0 }
 0x28c   : > { %v627_v42 = vmul.f32 %v753_v37, %v619_v39 }
 0x28d   : > { %v822_v43 = vpop.f32.mrf.mxu0 }
 0x28e   : > { %v635_v44 = vadd.f32 %v754_v40, %v627_v42 }
 0x290   : > { %636 = vst [vmem:[%s344_s23] sm:$0xff] %v635_v44 }
 0x291 PF: > { %s20_s27 = sadd.s32 1, %s976_s27  }
 0x292   : > { %p17_p2 = scmp.ge.s32.totalorder %s20_s27, 4  }
 0x294   :  { %19 = sbr.rel (!%p17_p2) target bundleno = 2 (0x2), region = 95 }
 0x299   :  { %656 = vsyncpa [#allocation3], 1 }
 0x29a   :  { %658 = vsyncpa [#allocation3 + $0x1], 1 }
 0x29b   :  { %659 = vsyncpa [#allocation5], 1 }

</bundles_post_ra>
